<compile_context>
chip_gen: v6e
topology: v6e:2x2x1
jax: 0.10.0
libtpu: 0.0.40
codegen_flags: <defaults>
</compile_context>

<pallas_src>
import jax
import jax.numpy as jnp
import numpy as np
from jax import lax
from jax.experimental import pallas as pl
from jax.experimental.pallas import tpu as pltpu


def _kernel(x_ref, sel_ref, w_ref, b_ref, out_ref,
            sum_acc, max_acc, min_acc):
    # x_ref:   [TB, TT, D]   current x tile
    # sel_ref: [3, D]        softmaxed selector, row 0 pre-scaled by 1/T
    # w_ref:   [O_pad, D]    fc1 weight (zero-padded rows past out_num)
    # b_ref:   [1, O_pad]    fc1 bias  (zero-padded)
    # out_ref: [TB, O_pad]   lane-dense output tile
    t = pl.program_id(1)

    @pl.when(t == 0)
    def _init():
        sum_acc[...] = jnp.zeros_like(sum_acc)
        max_acc[...] = jnp.full_like(max_acc, -jnp.inf)
        min_acc[...] = jnp.full_like(min_acc, jnp.inf)

    # single read of the tile; fused sum / max / min over the time axis,
    # accumulated in f32.
    x = x_ref[...].astype(jnp.float32)                    # [TB, TT, D]
    sum_acc[...] = sum_acc[...] + jnp.sum(x, axis=1)
    max_acc[...] = jnp.maximum(max_acc[...], jnp.max(x, axis=1))
    min_acc[...] = jnp.minimum(min_acc[...], jnp.min(x, axis=1))

    @pl.when(t == pl.num_programs(1) - 1)
    def _finalize():
        sel = sel_ref[...]                                # [3, D]
        # sel[0] already includes the 1/T mean scale (folded in the wrapper).
        pooled = (sum_acc[...] * sel[0:1, :]
                  + max_acc[...] * sel[1:2, :]
                  + min_acc[...] * sel[2:3, :])           # [TB, D]
        # [TB, D] x [O_pad, D]^T -> [TB, O_pad]  (no wrapper-side transpose)
        out = lax.dot_general(
            pooled, w_ref[...],
            dimension_numbers=(((1,), (1,)), ((), ())),
            preferred_element_type=jnp.float32)
        out_ref[...] = out + b_ref[...]


def _pick_tile(total, max_tile, multiple):
    """Largest tile <= max_tile that divides `total` and is a multiple of
    `multiple`; falls back to the full extent."""
    for cand in range(min(max_tile, total), 0, -1):
        if total % cand == 0 and cand % multiple == 0:
            return cand
    return total


def temporal_pooling_voting(x, pool_selector, fc1_w, fc1_b):
    """x: [B, T, D]; pool_selector: [D, 3]; fc1_w: [out_num, D]; fc1_b: [out_num].

    Returns [1, B, out_num] (matches the PyTorch forward for B > 1).
    """
    # TODO(synk): PyTorch's .squeeze() collapses the batch dim when B == 1;
    # this implementation keeps the B > 1 semantics.
    B, T, D = x.shape
    out_num = fc1_w.shape[0]

    # -- parameter-only work hoisted out of the kernel ------------------------
    sel_sm = jnp.transpose(jax.nn.softmax(pool_selector.astype(jnp.float32),
                                          axis=1), (1, 0))           # [3, D]
    # fold the 1/T mean scale into the GAP selector row
    sel_sm = sel_sm.at[0, :].multiply(jnp.float32(1.0 / float(T)))

    # lane-dense output: pad out_num up to a multiple of 128
    o_pad = max(128, pl.cdiv(out_num, 128) * 128)
    w_pad = jnp.zeros((o_pad, D), jnp.float32).at[:out_num, :].set(
        fc1_w.astype(jnp.float32))
    b_pad = jnp.zeros((1, o_pad), jnp.float32).at[0, :out_num].set(
        fc1_b.astype(jnp.float32))

    # -- tile selection --------------------------------------------------------
    # batch tile (parallel axis); out-spec sublane constraint: TB == B or TB % 8 == 0
    tb = B if B <= 8 else _pick_tile(B, 256, 8)
    # time tile (reduction axis, innermost); keep each double-buffered x block
    # ~2 MiB so the pipeline fits the default scoped-VMEM limit on all chips.
    bytes_per_elem = np.dtype(x.dtype).itemsize
    tt_budget = max(8, (2 * 1024 * 1024) // max(1, tb * D * bytes_per_elem))
    tt = T if T <= 8 else _pick_tile(T, tt_budget, 8)

    grid = (B // tb, T // tt)

    out_padded = pl.pallas_call(
        _kernel,
        out_shape=jax.ShapeDtypeStruct((B, o_pad), jnp.float32),
        grid=grid,
        in_specs=[
            pl.BlockSpec((tb, tt, D), lambda b, t: (b, t, 0)),   # x tile
            pl.BlockSpec((3, D), lambda b, t: (0, 0)),           # selector
            pl.BlockSpec((o_pad, D), lambda b, t: (0, 0)),       # fc1 weight
            pl.BlockSpec((1, o_pad), lambda b, t: (0, 0)),       # fc1 bias
        ],
        out_specs=pl.BlockSpec((tb, o_pad), lambda b, t: (b, 0)),
        scratch_shapes=[
            pltpu.VMEM((tb, D), jnp.float32),   # running sum
            pltpu.VMEM((tb, D), jnp.float32),   # running max
            pltpu.VMEM((tb, D), jnp.float32),   # running min
        ],
        compiler_params=pltpu.CompilerParams(
            dimension_semantics=("parallel", "arbitrary")),
    )(x, sel_sm, w_pad, b_pad)

    out = out_padded[:, :out_num]
    return out[None, :, :]                                      # [1, B, out_num]


def _reference(x, pool_selector, fc1_w, fc1_b):
    # pure-JAX reference mirroring the PyTorch forward (B > 1 case)
    pool_gap = jnp.mean(x, axis=1)
    pool_max = jnp.max(x, axis=1)
    pool_min = jnp.min(x, axis=1)
    sel = jax.nn.softmax(pool_selector, axis=1)
    pooled = (pool_gap * sel[:, 0] + pool_max * sel[:, 1]
              + pool_min * sel[:, 2])
    out = pooled[None, :, :] @ fc1_w.T + fc1_b
    return out


if __name__ == "__main__":
    # small shapes consistent with the module:
    #   data_length=[96, 32]  -> D = 128
    #   class_length=[8, 24]  -> out_num = 32
    B, T = 2, 16
    data_length = [96, 32]
    class_length = [8, 24]
    D = sum(data_length)
    out_num = sum(class_length)

    key = jax.random.PRNGKey(0)
    kx, ksel, kw, kb = jax.random.split(key, 4)

    x = jax.random.normal(kx, (B, T, D), dtype=jnp.float32)

    # deterministic parameter init (selector_init=False branch: randn)
    pool_selector = jax.random.normal(ksel, (D, 3), dtype=jnp.float32)
    # fc1: nn.Linear(D, out_num) -> weight [out_num, D], bias [out_num]
    bound = 1.0 / np.sqrt(D)
    fc1_w = jax.random.uniform(kw, (out_num, D), minval=-bound, maxval=bound,
                               dtype=jnp.float32)
    fc1_b = jax.random.uniform(kb, (out_num,), minval=-bound, maxval=bound,
                               dtype=jnp.float32)

    out = temporal_pooling_voting(x, pool_selector, fc1_w, fc1_b)
    out = jax.block_until_ready(out)

    ref = _reference(x, pool_selector, fc1_w, fc1_b)
    assert out.shape == (1, B, out_num), out.shape
    np.testing.assert_allclose(np.asarray(out), np.asarray(ref),
                               rtol=1e-5, atol=1e-5)

    print("KERNEL_OK")
</pallas_src>

<mosaic_0001>
module attributes {stable_mosaic.version = 11 : i64} {
  func.func @_kernel(%arg0: i32, %arg1: i32, %arg2: memref<2x16x128xf32, #tpu.memory_space<vmem>>, %arg3: memref<3x128xf32, #tpu.memory_space<vmem>>, %arg4: memref<128x128xf32, #tpu.memory_space<vmem>>, %arg5: memref<1x128xf32, #tpu.memory_space<vmem>>, %arg6: memref<2x128xf32, #tpu.memory_space<vmem>>, %arg7: memref<2x128xf32, #tpu.memory_space<vmem>>, %arg8: memref<2x128xf32, #tpu.memory_space<vmem>>, %arg9: memref<2x128xf32, #tpu.memory_space<vmem>>) attributes {dimension_semantics = [#tpu.dimension_semantics<parallel>, #tpu.dimension_semantics<arbitrary>], iteration_bounds = array<i64: 1, 1>, scalar_prefetch = 0 : i64, scratch_operands = 3 : i64, tpu.core_type = #tpu.core_type<tc>, window_params = [{transform_indices = @transform_0, window_bounds = array<i64: 2, 16, 128>}, {pipeline_mode = #tpu.pipeline_mode<synchronous>, transform_indices = @transform_1, window_bounds = array<i64: 3, 128>}, {pipeline_mode = #tpu.pipeline_mode<synchronous>, transform_indices = @transform_2, window_bounds = array<i64: 128, 128>}, {pipeline_mode = #tpu.pipeline_mode<synchronous>, transform_indices = @transform_3, window_bounds = array<i64: 1, 128>}, {transform_indices = @transform_4, window_bounds = array<i64: 2, 128>}]} {
    %c0_i32 = arith.constant 0 : i32
    %0 = arith.cmpi eq, %arg1, %c0_i32 : i32
    %1 = arith.extui %0 : i1 to i32
    %c0_i32_0 = arith.constant 0 : i32
    %2 = arith.cmpi ne, %1, %c0_i32_0 : i32
    scf.if %2 {
      %cst_19 = arith.constant 0.000000e+00 : f32
      %19 = vector.broadcast %cst_19 : f32 to vector<2x128xf32>
      %c0_20 = arith.constant 0 : index
      %c0_21 = arith.constant 0 : index
      %20 = vector.load %arg7[%c0_20, %c0_21] : memref<2x128xf32, #tpu.memory_space<vmem>>, vector<2x128xf32>
      tpu.vector_store %arg7[%c0_20, %c0_21], %19 {strides = array<i32>} : memref<2x128xf32, #tpu.memory_space<vmem>>, vector<2x128xf32>,
      %cst_22 = arith.constant 0xFF800000 : f32
      %21 = vector.broadcast %cst_22 : f32 to vector<2x128xf32>
      %c0_23 = arith.constant 0 : index
      %c0_24 = arith.constant 0 : index
      %22 = vector.load %arg8[%c0_23, %c0_24] : memref<2x128xf32, #tpu.memory_space<vmem>>, vector<2x128xf32>
      tpu.vector_store %arg8[%c0_23, %c0_24], %21 {strides = array<i32>} : memref<2x128xf32, #tpu.memory_space<vmem>>, vector<2x128xf32>,
      %cst_25 = arith.constant 0x7F800000 : f32
      %23 = vector.broadcast %cst_25 : f32 to vector<2x128xf32>
      %c0_26 = arith.constant 0 : index
      %c0_27 = arith.constant 0 : index
      %24 = vector.load %arg9[%c0_26, %c0_27] : memref<2x128xf32, #tpu.memory_space<vmem>>, vector<2x128xf32>
      tpu.vector_store %arg9[%c0_26, %c0_27], %23 {strides = array<i32>} : memref<2x128xf32, #tpu.memory_space<vmem>>, vector<2x128xf32>,
    } else {
    }
    %c0 = arith.constant 0 : index
    %c0_1 = arith.constant 0 : index
    %c0_2 = arith.constant 0 : index
    %3 = vector.load %arg2[%c0, %c0_1, %c0_2] : memref<2x16x128xf32, #tpu.memory_space<vmem>>, vector<2x16x128xf32>
    %c0_3 = arith.constant 0 : index
    %c0_4 = arith.constant 0 : index
    %4 = vector.load %arg7[%c0_3, %c0_4] : memref<2x128xf32, #tpu.memory_space<vmem>>, vector<2x128xf32>
    %cst = arith.constant dense<0.000000e+00> : vector<2x128xf32>
    %5 = vector.multi_reduction <add>, %3, %cst [1] : vector<2x16x128xf32> to vector<2x128xf32>
    %6 = arith.addf %4, %5 : vector<2x128xf32>
    %c0_5 = arith.constant 0 : index
    %c0_6 = arith.constant 0 : index
    %7 = vector.load %arg7[%c0_5, %c0_6] : memref<2x128xf32, #tpu.memory_space<vmem>>, vector<2x128xf32>
    tpu.vector_store %arg7[%c0_5, %c0_6], %6 {strides = array<i32>} : memref<2x128xf32, #tpu.memory_space<vmem>>, vector<2x128xf32>,
    %c0_7 = arith.constant 0 : index
    %c0_8 = arith.constant 0 : index
    %8 = vector.load %arg8[%c0_7, %c0_8] : memref<2x128xf32, #tpu.memory_space<vmem>>, vector<2x128xf32>
    %cst_9 = arith.constant dense<0xFF800000> : vector<2x128xf32>
    %9 = vector.multi_reduction <maximumf>, %3, %cst_9 [1] : vector<2x16x128xf32> to vector<2x128xf32>
    %10 = arith.maximumf %8, %9 : vector<2x128xf32>
    %c0_10 = arith.constant 0 : index
    %c0_11 = arith.constant 0 : index
    %11 = vector.load %arg8[%c0_10, %c0_11] : memref<2x128xf32, #tpu.memory_space<vmem>>, vector<2x128xf32>
    tpu.vector_store %arg8[%c0_10, %c0_11], %10 {strides = array<i32>} : memref<2x128xf32, #tpu.memory_space<vmem>>, vector<2x128xf32>,
    %c0_12 = arith.constant 0 : index
    %c0_13 = arith.constant 0 : index
    %12 = vector.load %arg9[%c0_12, %c0_13] : memref<2x128xf32, #tpu.memory_space<vmem>>, vector<2x128xf32>
    %cst_14 = arith.constant dense<0x7F800000> : vector<2x128xf32>
    %13 = vector.multi_reduction <minimumf>, %3, %cst_14 [1] : vector<2x16x128xf32> to vector<2x128xf32>
    %14 = arith.minimumf %12, %13 : vector<2x128xf32>
    %c0_15 = arith.constant 0 : index
    %c0_16 = arith.constant 0 : index
    %15 = vector.load %arg9[%c0_15, %c0_16] : memref<2x128xf32, #tpu.memory_space<vmem>>, vector<2x128xf32>
    tpu.vector_store %arg9[%c0_15, %c0_16], %14 {strides = array<i32>} : memref<2x128xf32, #tpu.memory_space<vmem>>, vector<2x128xf32>,
    %c0_i32_17 = arith.constant 0 : i32
    %16 = arith.cmpi eq, %arg1, %c0_i32_17 : i32
    %17 = arith.extui %16 : i1 to i32
    %c0_i32_18 = arith.constant 0 : i32
    %18 = arith.cmpi ne, %17, %c0_i32_18 : i32
    scf.if %18 {
      %c0_19 = arith.constant 0 : index
      %c0_20 = arith.constant 0 : index
      %19 = vector.load %arg3[%c0_19, %c0_20] : memref<3x128xf32, #tpu.memory_space<vmem>>, vector<3x128xf32>
      %c0_21 = arith.constant 0 : index
      %c0_22 = arith.constant 0 : index
      %20 = vector.load %arg7[%c0_21, %c0_22] : memref<2x128xf32, #tpu.memory_space<vmem>>, vector<2x128xf32>
      %21 = vector.extract_strided_slice %19 {offsets = [0, 0], sizes = [1, 128], strides = [1, 1]} : vector<3x128xf32> to vector<1x128xf32>
      %22 = vector.broadcast %21 : vector<1x128xf32> to vector<2x128xf32>
      %23 = arith.mulf %20, %22 : vector<2x128xf32>
      %c0_23 = arith.constant 0 : index
      %c0_24 = arith.constant 0 : index
      %24 = vector.load %arg8[%c0_23, %c0_24] : memref<2x128xf32, #tpu.memory_space<vmem>>, vector<2x128xf32>
      %25 = vector.extract_strided_slice %19 {offsets = [1, 0], sizes = [1, 128], strides = [1, 1]} : vector<3x128xf32> to vector<1x128xf32>
      %26 = vector.broadcast %25 : vector<1x128xf32> to vector<2x128xf32>
      %27 = arith.mulf %24, %26 : vector<2x128xf32>
      %28 = arith.addf %23, %27 : vector<2x128xf32>
      %c0_25 = arith.constant 0 : index
      %c0_26 = arith.constant 0 : index
      %29 = vector.load %arg9[%c0_25, %c0_26] : memref<2x128xf32, #tpu.memory_space<vmem>>, vector<2x128xf32>
      %30 = vector.extract_strided_slice %19 {offsets = [2, 0], sizes = [1, 128], strides = [1, 1]} : vector<3x128xf32> to vector<1x128xf32>
      %31 = vector.broadcast %30 : vector<1x128xf32> to vector<2x128xf32>
      %32 = arith.mulf %29, %31 : vector<2x128xf32>
      %33 = arith.addf %28, %32 : vector<2x128xf32>
      %c0_27 = arith.constant 0 : index
      %c0_28 = arith.constant 0 : index
      %34 = vector.load %arg4[%c0_27, %c0_28] : memref<128x128xf32, #tpu.memory_space<vmem>>, vector<128x128xf32>
      %cst_29 = arith.constant dense<0.000000e+00> : vector<2x128xf32>
      %35 = tpu.matmul %33, %34, %cst_29 {dimension_numbers = #tpu.dot_dimension_numbers<[1], [1], [0], [0], [0, 0, 1, 0], [], []>} : vector<2x128xf32>, vector<128x128xf32>, vector<2x128xf32> -> vector<2x128xf32>
      %c0_30 = arith.constant 0 : index
      %c0_31 = arith.constant 0 : index
      %36 = vector.load %arg5[%c0_30, %c0_31] : memref<1x128xf32, #tpu.memory_space<vmem>>, vector<1x128xf32>
      %37 = vector.broadcast %36 : vector<1x128xf32> to vector<2x128xf32>
      %38 = arith.addf %35, %37 : vector<2x128xf32>
      %c0_32 = arith.constant 0 : index
      %c0_33 = arith.constant 0 : index
      %39 = vector.load %arg6[%c0_32, %c0_33] : memref<2x128xf32, #tpu.memory_space<vmem>>, vector<2x128xf32>
      tpu.vector_store %arg6[%c0_32, %c0_33], %38 {strides = array<i32>} : memref<2x128xf32, #tpu.memory_space<vmem>>, vector<2x128xf32>,
    } else {
    }
    return
  }
  func.func @transform_0(%arg0: i32, %arg1: i32) -> (i32, i32, i32) {
    %c0_i32 = arith.constant 0 : i32
    %c0_i32_0 = arith.constant 0 : i32
    return %arg0, %arg1, %c0_i32 : i32, i32, i32
  }
  func.func @transform_1(%arg0: i32, %arg1: i32) -> (i32, i32) {
    %c0_i32 = arith.constant 0 : i32
    %c0_i32_0 = arith.constant 0 : i32
    %c0_i32_1 = arith.constant 0 : i32
    return %c0_i32, %c0_i32_0 : i32, i32
  }
  func.func @transform_2(%arg0: i32, %arg1: i32) -> (i32, i32) {
    %c0_i32 = arith.constant 0 : i32
    %c0_i32_0 = arith.constant 0 : i32
    %c0_i32_1 = arith.constant 0 : i32
    return %c0_i32, %c0_i32_0 : i32, i32
  }
  func.func @transform_3(%arg0: i32, %arg1: i32) -> (i32, i32) {
    %c0_i32 = arith.constant 0 : i32
    %c0_i32_0 = arith.constant 0 : i32
    %c0_i32_1 = arith.constant 0 : i32
    return %c0_i32, %c0_i32_0 : i32, i32
  }
  func.func @transform_4(%arg0: i32, %arg1: i32) -> (i32, i32) {
    %c0_i32 = arith.constant 0 : i32
    %c0_i32_0 = arith.constant 0 : i32
    return %arg0, %c0_i32 : i32, i32
  }
}

</mosaic_0001>

<bundles_post_ra>
// kernel: tpu_custom_call.1
= control target key start
LH: loop header
LB: loop body
LE: loop exit
PB: predicated region body
PF: predicated region fallthrough
CT: control target
= control target key end

     0   :  { %9 = vsyncpa [#allocation6], 0  ;;  %s483_s0 = inlined_call_operand.hbm [shape: f32[2,16,128], index: 0, kind: input, shape index: {}]   ;;  %s484_s1 = inlined_call_operand.hbm [shape: f32[3,128], index: 1, kind: input, shape index: {}]   ;;  %s485_s2 = inlined_call_operand.hbm [shape: f32[128,128], index: 2, kind: input, shape index: {}]   ;;  %s486_s3 = inlined_call_operand.vmem [shape: f32[1,128], index: 3, kind: input, shape index: {}]   ;;  %s487_s4 = inlined_call_operand.hbm [shape: f32[2,128], index: 4, kind: output, shape index: {}]  }
   0x1   :  { %10 = vsyncpa [#allocation9], 0 }
   0x2   :  { %11 = vsyncpa [#allocation7], 0  ;;  %s415_s15 = smov [#allocation8]   ;;  %s416_s17 = smov [#allocation5]  }
   0x3   :  { %s30_s16 = sshll.u32 %s415_s15, 4  ;;  %s17_s18 = sshll.u32 %s416_s17, 4  ;;  %s31_s16 = int_to_ptr.vmem [resolvable:$true] %s30_s16  ;;  %s18_s18 = int_to_ptr.vmem [resolvable:$true] %s17_s18 }
   0x4   :  { %s337_s19 = scalar_lea.vmem %s31_s16, 64  ;;  %p342_p1 = scmp.lt.s32.totalorder %s31_s16, %s31_s16 }
   0x5   :  { %p338_p0 = scmp.ne.s32.totalorder %s31_s16, %s337_s19  ;;  %p343_p2 = scmp.lt.s32.totalorder %s337_s19, %s337_s19 }
   0x7   :  { %p344_p3 = por %p343_p2, %p342_p1 }
   0x9   :  { %p345_p4 = pnand %p344_p3, %p338_p0 }
   0xb   :  { %348 = shalt.err (!%p345_p4)
}
   0xc   :  { %33 = dma.hbm_to_vmem [thread:$0]  %s484_s1, 64, %s31_s16, [#allocation9]  }
   0xd   :  { %s357_s22 = scalar_lea.vmem %s18_s18, 512  ;;  %p362_p6 = scmp.lt.s32.totalorder %s18_s18, %s18_s18 }
   0xe   :  { %p358_p5 = scmp.ne.s32.totalorder %s18_s18, %s357_s22  ;;  %p363_p7 = scmp.lt.s32.totalorder %s357_s22, %s357_s22 }
  0x10   :  { %p364_p8 = por %p363_p7, %p362_p6 }
  0x12   :  { %p365_p9 = pnand %p364_p8, %p358_p5 }
  0x14   :  { %368 = shalt.err (!%p365_p9)
}
  0x15   :  { %s417_s23 = smov 128   ;;  %s418_s24 = smov 8  }
  0x16   :  { %23 = dma.hbm_to_vmem [thread:$0]  %s483_s0, 512, %s18_s18, [#allocation6], %s417_s23, %s417_s23, %s418_s24  }
  0x17   :  { %s419_s27 = smov [#allocation10]  }
  0x18   :  { %s39_s28 = sshll.u32 %s419_s27, 4  ;;  %s40_s28 = int_to_ptr.vmem [resolvable:$true] %s39_s28 }
  0x19   :  { %s377_s29 = scalar_lea.vmem %s40_s28, 2048  ;;  %p382_p11 = scmp.lt.s32.totalorder %s40_s28, %s40_s28 }
  0x1a   :  { %p378_p10 = scmp.ne.s32.totalorder %s40_s28, %s377_s29  ;;  %p383_p12 = scmp.lt.s32.totalorder %s377_s29, %s377_s29 }
  0x1c   :  { %p384_p13 = por %p383_p12, %p382_p11 }
  0x1e   :  { %p385_p0 = pnand %p384_p13, %p378_p10 }
  0x20   :  { %388 = shalt.err (!%p385_p0)
}
  0x21   :  { %45 = dma.hbm_to_vmem [thread:$0]  %s485_s2, 2048, %s40_s28, [#allocation9], %s417_s23, %s417_s23, %s418_s24  }
  0x22   :  { %409 = dma.done.wait [#allocation6], 512  }
  0x23   :  { %410 = vsyncadd [#allocation6], 4294966784 }
  0x24   :  { %411 = dma.done.wait [#allocation9], 2112  }
  0x25   :  { %412 = vsyncadd [#allocation9], 4294965184  ;;  %v420_v0 = vmov 0.0   ;;  %vm421_vm0 = vmmov 0   ;;  %v422_v1 = vmov -inf   ;;  %v423_v2 = vmov inf  }
  0x26   :  { %284 = vmatprep.subr.mxu0 %v420_v0  ;;  %61 = vst [vmem:[#allocation2] sm:$0x3] %v420_v0  ;;  %316 = vmatprep.mubr.msk.f32.mxu0 %vm421_vm0, %v420_v0  ;;  %62 = vst [vmem:[#allocation3] sm:$0x3] %v422_v1  ;;  %v171_v3 = vld [vmem:[#allocation10 + $0x78] sm:$0xff]  ;;  %v170_v4 = vld [vmem:[#allocation10 + $0x70] sm:$0xff] }
  0x27   :  { %63 = vst [vmem:[#allocation4] sm:$0x3] %v423_v2  ;;  %285 = vmatpush3.xpose.msra.mxu0 %v171_v3  ;;  %v64_v5 = vld [vmem:[#allocation5] sm:$0xff]  ;;  %v65_v6 = vld [vmem:[#allocation5 + $0x8] sm:$0xff]  ;;  %v66_v8 = vld [vmem:[#allocation5 + $0x10] sm:$0xff]  ;;  %vm85_vm1 = vcmask 1041409  }
  0x28   :  { %286 = vmatprep.subr.mxu0 %v420_v0  ;;  %v169_v7 = vld [vmem:[#allocation10 + $0x68] sm:$0xff]  ;;  %v67_v9 = vld [vmem:[#allocation5 + $0x18] sm:$0xff]  ;;  %v69_v10 = vadd.f32 %v65_v6, %v64_v5  ;;  %v91_v11 = vmax.f32 %v64_v5, %v65_v6  ;;  %v112_v12 = vmin.f32 %v64_v5, %v65_v6  ;;  %v168_v22 = vld [vmem:[#allocation10 + $0x60] sm:$0xff]  ;;  %v137_v5 = vlaneseq  ;;  %s424_s5 = smov [#allocation11]  }
  0x29   :  { %v76_v13 = vadd.f32 %v67_v9, %v66_v8  ;;  %v98_v14 = vmax.f32 %v66_v8, %v67_v9  ;;  %v119_v15 = vmin.f32 %v66_v8, %v67_v9  ;;  %v167_v35 = vld [vmem:[#allocation10 + $0x58] sm:$0xff]  ;;  %v166_v48 = vld [vmem:[#allocation10 + $0x50] sm:$0xff]  ;;  %v165_v61 = vld [vmem:[#allocation10 + $0x48] sm:$0xff]  ;;  %s256_s6 = sshll.u32 %s424_s5, 4  ;;  %s257_s6 = int_to_ptr.vmem [resolvable:$true] %s256_s6 }
  0x2a   :  { %v70_v16 = vrot.slane %v69_v10, 4  ;;  %v92_v17 = vrot.slane %v91_v11, 4  ;;  %v113_v18 = vrot.slane %v112_v12, 4  ;;  %v164_v2 = vld [vmem:[#allocation10 + $0x40] sm:$0xff]  ;;  %v163_v3 = vld [vmem:[#allocation10 + $0x38] sm:$0xff]  ;;  %v161_v6 = vld [vmem:[#allocation10 + $0x28] sm:$0xff]  ;;  %p394_p2 = scmp.lt.s32.totalorder %s257_s6, %s257_s6 }
  0x2b   :  { %287 = vmatpush3.xpose.msra.mxu0 %v170_v4  ;;  %v77_v19 = vrot.slane %v76_v13, 4  ;;  %v99_v20 = vrot.slane %v98_v14, 4  ;;  %v120_v21 = vrot.slane %v119_v15, 4  ;;  %v162_v4 = vld [vmem:[#allocation10 + $0x30] sm:$0xff]  ;;  %v160_v8 = vld [vmem:[#allocation10 + $0x20] sm:$0xff]  ;;  %s389_s7 = scalar_lea.vmem %s257_s6, 32 }
  0x2c   :  { %288 = vmatprep.subr.mxu0 %v420_v0  ;;  %v71_v23 = vadd.f32 %v70_v16, %v69_v10  ;;  %v93_v24 = vmax.f32 %v91_v11, %v92_v17  ;;  %v114_v25 = vmin.f32 %v112_v12, %v113_v18  ;;  %v135_v11 = vld [vmem:[#allocation8] sm:$0x7]  ;;  %v158_v18 = vld [vmem:[#allocation10 + $0x10] sm:$0xff]  ;;  %p390_p1 = scmp.ne.s32.totalorder %s257_s6, %s389_s7  ;;  %p395_p3 = scmp.lt.s32.totalorder %s389_s7, %s389_s7 }
  0x2d   :  { %v78_v26 = vadd.f32 %v77_v19, %v76_v13  ;;  %v100_v27 = vmax.f32 %v98_v14, %v99_v20  ;;  %v121_v28 = vmin.f32 %v119_v15, %v120_v21  ;;  %v68_v52 = vld [vmem:[#allocation2] sm:$0x3]  ;;  %v90_v54 = vld [vmem:[#allocation3] sm:$0x3] }
  0x2e   :  { %v72_v29 = vrot.slane %v71_v23, 2  ;;  %v94_v30 = vrot.slane %v93_v24, 2  ;;  %v115_v31 = vrot.slane %v114_v25, 2  ;;  %v111_v56 = vld [vmem:[#allocation4] sm:$0x3]  ;;  %p396_p4 = por %p395_p3, %p394_p2 }
  0x2f   :  { %289 = vmatpush3.xpose.msra.mxu0 %v169_v7  ;;  %v79_v32 = vrot.slane %v78_v26, 2  ;;  %v101_v33 = vrot.slane %v100_v27, 2  ;;  %v122_v34 = vrot.slane %v121_v28, 2  ;;  %v138_v7 = vshrl.u32 %v137_v5, 7  ;;  %v159_v12 = vld [vmem:[#allocation10 + $0x18] sm:$0xff] }
  0x30   :  { %290 = vmatprep.subr.mxu0 %v420_v0  ;;  %v73_v36 = vadd.f32 %v72_v29, %v71_v23  ;;  %v95_v37 = vmax.f32 %v93_v24, %v94_v30  ;;  %v116_v38 = vmin.f32 %v114_v25, %v115_v31  ;;  %v157_v23 = vld [vmem:[#allocation10 + $0x8] sm:$0xff]  ;;  %p397_p5 = pnand %p396_p4, %p390_p1 }
  0x31   :  { %v80_v39 = vadd.f32 %v79_v32, %v78_v26  ;;  %v102_v40 = vmax.f32 %v100_v27, %v101_v33  ;;  %v123_v41 = vmin.f32 %v121_v28, %v122_v34  ;;  %v139_v9 = vsub.s32 0, %v138_v7  ;;  %v156_v26 = vld [vmem:[#allocation10] sm:$0xff]  ;;  %v266_v28 = vld [vmem:[%s486_s3] ss:$0 sm:$0xff] }
  0x32   :  { %v74_v42 = vrot.slane %v73_v36, 1  ;;  %v96_v43 = vrot.slane %v95_v37, 1  ;;  %v117_v44 = vrot.slane %v116_v38, 1  ;;  %v145_v10 = vsub.s32 1, %v138_v7 }
  0x33   :  { %291 = vmatpush3.xpose.msra.mxu0 %v168_v22  ;;  %v81_v45 = vrot.slane %v80_v39, 1  ;;  %v103_v46 = vrot.slane %v102_v40, 1  ;;  %v124_v47 = vrot.slane %v123_v41, 1  ;;  %v140_v13 = vrot.slane %v135_v11, %v139_v9 }
  0x34   :  { %292 = vmatprep.subr.mxu0 %v420_v0  ;;  %v75_v49 = vadd.f32 %v74_v42, %v73_v36  ;;  %v97_v50 = vmax.f32 %v95_v37, %v96_v43  ;;  %v118_v51 = vmin.f32 %v116_v38, %v117_v44  ;;  %v146_v14 = vrot.slane %v135_v11, %v145_v10 }
  0x35   :  { %v82_v53 = vadd.f32 %v81_v45, %v80_v39  ;;  %v104_v55 = vmax.f32 %v102_v40, %v103_v46  ;;  %v125_v57 = vmin.f32 %v123_v41, %v124_v47  ;;  %v152_v15 = vsub.s32 2, %v138_v7 }
  0x37   :  { %293 = vmatpush3.xpose.msra.mxu0 %v167_v35  ;;  %v86_v58 = vsel %vm85_vm1, %v82_v53, %v75_v49  ;;  %v107_v59 = vsel %vm85_vm1, %v104_v55, %v97_v50  ;;  %v128_v60 = vsel %vm85_vm1, %v125_v57, %v118_v51  ;;  %v153_v21 = vrot.slane %v135_v11, %v152_v15 }
  0x38   :  { %294 = vmatprep.subr.mxu0 %v420_v0  ;;  %v88_v62 = vadd.f32 %v86_v58, %v68_v52  ;;  %v109_v63 = vmax.f32 %v90_v54, %v107_v59  ;;  %v130_v1 = vmin.f32 %v111_v56, %v128_v60 }
  0x3a   :  { %89 = vst [vmem:[#allocation2] sm:$0x3] %v88_v62  ;;  %110 = vst [vmem:[#allocation3] sm:$0x3] %v109_v63 }
  0x3b   :  { %295 = vmatpush3.xpose.msra.mxu0 %v166_v48  ;;  %131 = vst [vmem:[#allocation4] sm:$0x3] %v130_v1 }
  0x3c   :  { %296 = vmatprep.subr.mxu0 %v420_v0 }
  0x3f   :  { %297 = vmatpush3.xpose.msra.mxu0 %v165_v61 }
  0x40   :  { %298 = vmatprep.subr.mxu0 %v420_v0 }
  0x41   :  { %v136_v16 = vld [vmem:[#allocation2] sm:$0x3]  ;;  %v142_v17 = vld [vmem:[#allocation3] sm:$0x3] }
  0x42   :  { %v141_v19 = vmul.f32 %v140_v13, %v136_v16  ;;  %v147_v20 = vmul.f32 %v146_v14, %v142_v17  ;;  %v149_v22 = vld [vmem:[#allocation4] sm:$0x3] }
  0x43   :  { %299 = vmatpush3.xpose.msra.mxu0 %v164_v2  ;;  %v154_v25 = vmul.f32 %v153_v21, %v149_v22 }
  0x44   :  { %300 = vmatprep.subr.mxu0 %v420_v0  ;;  %v148_v24 = vadd.f32 %v147_v20, %v141_v19 }
  0x46   :  { %v155_v27 = vadd.f32 %v154_v25, %v148_v24 }
  0x47   :  { %301 = vmatpush3.xpose.msra.mxu0 %v163_v3 }
  0x48   :  { %302 = vmatprep.subr.mxu0 %v420_v0 }
  0x4b   :  { %303 = vmatpush3.xpose.msra.mxu0 %v162_v4 }
  0x4c   :  { %304 = vmatprep.subr.mxu0 %v420_v0 }
  0x4f   :  { %305 = vmatpush3.xpose.msra.mxu0 %v161_v6 }
  0x50   :  { %306 = vmatprep.subr.mxu0 %v420_v0 }
  0x53   :  { %307 = vmatpush3.xpose.msra.mxu0 %v160_v8 }
  0x54   :  { %308 = vmatprep.subr.mxu0 %v420_v0 }
  0x57   :  { %309 = vmatpush3.xpose.msra.mxu0 %v159_v12 }
  0x58   :  { %310 = vmatprep.subr.mxu0 %v420_v0 }
  0x5b   :  { %311 = vmatpush3.xpose.msra.mxu0 %v158_v18 }
  0x5c   :  { %312 = vmatprep.subr.mxu0 %v420_v0 }
  0x5f   :  { %313 = vmatpush3.xpose.msra.mxu0 %v157_v23 }
  0x60   :  { %314 = vmatprep.subr.mxu0 %v420_v0 }
  0x63   :  { %315 = vmatpush3.xpose.msra.mxu0 %v156_v26 }
  0x66   :  { %317 = vmatmul.mubr.f32.vlgmr.msra.gmra.mxu0 %v155_v27 }
 0x126   :  { %v245_v29 = vpop.f32.mrf.mxu0 }
 0x127   :  { %v246_v30 = vadd.f32 %v266_v28, %v245_v29 }
 0x128   :  { %v318_v31 = vpop.f32.mrf.mxu0 }
 0x129   :  { %249 = vst [vmem:[#allocation11] sm:$0x3] %v246_v30 }
 0x12a   :  { %400 = shalt.err (!%p397_p5)
}
 0x12b   :  { %259 = dma.vmem_to_hbm [thread:$0]  %s257_s6, 32, %s487_s4, [#allocation7]  }
 0x12c   :  { %413 = dma.done.wait [#allocation7], 32  }
 0x12d   :  { %414 = vsyncadd [#allocation7], 4294967264 }
 0x12e   :  { %263 = vsyncpa [#allocation6], 1 }
 0x12f   :  { %264 = vsyncpa [#allocation9], 1 }
 0x130   :  { %265 = vsyncpa [#allocation7], 1 }

</bundles_post_ra>
